<compile_context>
chip_gen: v5e
topology: v5e:2x2
jax: 0.10.0
libtpu: 0.0.40
codegen_flags: <defaults>
</compile_context>

<pallas_src>
import math
import functools

import jax
import jax.numpy as jnp
from jax.experimental import pallas as pl
from jax.experimental.pallas import tpu as pltpu


# ---------------------------------------------------------------------------
# helpers
# ---------------------------------------------------------------------------

_GELU_C = math.sqrt(2.0 / math.pi)


def _gelu_tanh(x):
    # GELU with tanh approximation (matches nn.GELU(approximate='tanh')).
    return 0.5 * x * (1.0 + jnp.tanh(_GELU_C * (x + 0.044715 * x * x * x)))


def _round_up(x, m):
    return ((x + m - 1) // m) * m


def _cdiv(a, b):
    return (a + b - 1) // b


def _vmem_capacity_bytes():
    """Per-core physical VMEM; conservative (v7x-sized) fallback if the query
    fails so the chosen tiles are safe on every generation."""
    try:
        info = pltpu.get_tpu_info()
        cap = int(getattr(info, "vmem_capacity_bytes", 0))
        if cap > 0:
            return cap
    except Exception:
        pass
    return 64 * 1024 * 1024


def _pick_chunks(tile_h):
    """Split a hidden tile into 2-4 lane-aligned chunks so dot1 of chunk k+1
    can issue on the MXU while GELU of chunk k runs on VPU/EUP."""
    for n in (4, 2):
        if tile_h % n == 0 and (tile_h // n) % 128 == 0:
            return n, tile_h // n
    return 1, tile_h


def _const_spec(shape):
    """BlockSpec for a grid-invariant (weight) operand: single-buffered."""
    index_map = lambda i: (0,) * len(shape)
    try:
        return pl.BlockSpec(shape, index_map, pipeline_mode=pl.Buffered(1))
    except Exception:
        # Older jax without pipeline_mode: fall back to default buffering.
        return pl.BlockSpec(shape, index_map)


# ---------------------------------------------------------------------------
# kernels
# ---------------------------------------------------------------------------

def _make_resident_kernel(n_chunks, chunk_h):
    """1-D token grid; W1/b1/W2/b2 fully resident in VMEM."""

    def kernel(x_ref, w1_ref, b1_ref, w2_ref, b2_ref, o_ref):
        x = x_ref[...]
        acc = jnp.zeros(o_ref.shape, jnp.float32)
        for k in range(n_chunks):           # static unroll: MXU/VPU interleave
            lo = k * chunk_h
            h = jnp.dot(x, w1_ref[:, lo:lo + chunk_h],
                        preferred_element_type=jnp.float32)
            h = h + b1_ref[:, lo:lo + chunk_h].astype(jnp.float32)
            h = _gelu_tanh(h).astype(w2_ref.dtype)   # f32 GELU, cast for MXU
            acc = acc + jnp.dot(h, w2_ref[lo:lo + chunk_h, :],
                                preferred_element_type=jnp.float32)
        o_ref[...] = (acc + b2_ref[...].astype(jnp.float32)).astype(o_ref.dtype)

    return kernel


def _make_tiled_kernel(n_chunks, chunk_h):
    """2-D grid (token tiles x hidden slices) with an f32 accumulator."""

    def kernel(x_ref, w1_ref, b1_ref, w2_ref, b2_ref, o_ref, acc_ref):
        hj = pl.program_id(1)

        @pl.when(hj == 0)
        def _():
            acc_ref[...] = jnp.zeros_like(acc_ref)

        x = x_ref[...]
        part = jnp.zeros(acc_ref.shape, jnp.float32)
        for k in range(n_chunks):           # static unroll
            lo = k * chunk_h
            h = jnp.dot(x, w1_ref[:, lo:lo + chunk_h],
                        preferred_element_type=jnp.float32)
            h = h + b1_ref[:, lo:lo + chunk_h].astype(jnp.float32)
            h = _gelu_tanh(h).astype(w2_ref.dtype)
            part = part + jnp.dot(h, w2_ref[lo:lo + chunk_h, :],
                                  preferred_element_type=jnp.float32)
        acc_ref[...] += part

        @pl.when(hj == pl.num_programs(1) - 1)
        def _():
            o_ref[...] = (acc_ref[...] + b2_ref[...].astype(jnp.float32)
                          ).astype(o_ref.dtype)

    return kernel


# ---------------------------------------------------------------------------
# wrapper
# ---------------------------------------------------------------------------

@functools.partial(jax.jit, static_argnames=("tile_m", "tile_h"))
def mlp_forward(x, w1, b1, w2, b2, *, tile_m=None, tile_h=None):
    """MLP forward: GELU_tanh(x @ W1 + b1) @ W2 + b2.

    x: [B, T, C]; w1: [C, 4C]; b1: [4C]; w2: [4C, C]; b2: [C].
    Weights stored [in, out] (transposed vs. torch nn.Linear.weight).
    """
    B, T, C = x.shape
    H = w1.shape[1]
    M = B * T
    x2 = x.reshape(M, C)
    b1_2 = b1.reshape(1, H)
    b2_2 = b2.reshape(1, C)

    dsize = jnp.dtype(x.dtype).itemsize
    wsize = jnp.dtype(w1.dtype).itemsize
    align = max(8, 32 // dsize)          # 8 rows f32, 16 bf16, 32 int8

    capacity = _vmem_capacity_bytes()
    budget = int(0.80 * capacity)        # headroom for Mosaic internal scratch

    w_bytes = (2 * C * H + H + C) * wsize   # W1 + W2 + b1 + b2, single-buffered

    # ---- hidden-dim tiling: weights resident in VMEM if they fit ----------
    if tile_h is not None and 0 < tile_h < H and H % tile_h == 0 and tile_h % 128 == 0:
        resident = False
        tile_h_eff = tile_h
    else:
        resident = w_bytes <= (budget * 13) // 20        # ~65% of budget
        if resident:
            tile_h_eff = H
        else:
            # Largest multiple of 128 dividing H whose double-buffered W1/W2
            # slices stay within ~half the budget (avoid the tile_h=H cliff).
            tile_h_eff = 128 if H % 128 == 0 else H
            if H % 128 == 0:
                t = 128
                while t <= H:
                    if H % t == 0 and 4 * C * t * wsize <= budget // 2:
                        tile_h_eff = t
                    t += 128

    n_chunks, chunk_h = _pick_chunks(tile_h_eff)

    # ---- token tiling: as large as VMEM allows -----------------------------
    per_m = (4 * C * dsize                  # x + out slabs, double-buffered
             + 4 * C                        # f32 accumulator row
             + 2 * chunk_h * (4 + wsize))   # live f32 + downcast h chunks
    if resident:
        fixed = w_bytes
    else:
        fixed = 4 * C * tile_h_eff * wsize + 2 * (tile_h_eff + C) * wsize

    if tile_m is None:
        target = 1024 if budget >= (80 << 20) else 512
        cap_rows = max(align, ((budget - fixed) // max(per_m, 1)) // align * align)
        tile_m_eff = min(target, cap_rows, _round_up(M, align))
        tile_m_eff = max(align, (tile_m_eff // align) * align)
        # Megacore (v7x): keep >= 2 token blocks when there is enough work.
        if M >= 512 and _round_up(M, tile_m_eff) // tile_m_eff < 2:
            tile_m_eff = max(align, _round_up(_cdiv(M, 2), align))
    else:
        tile_m_eff = max(align, min(_round_up(tile_m, align), _round_up(M, align)))

    Mp = _round_up(M, tile_m_eff)
    if Mp != M:
        # Zero-pad the ragged tail; padded rows stay finite through the GELU
        # and are sliced off below.
        x2 = jnp.pad(x2, ((0, Mp - M), (0, 0)))

    num_m_tiles = Mp // tile_m_eff
    needed = fixed + tile_m_eff * per_m
    vmem_limit = min(max(int(needed) + (4 << 20), 32 << 20),
                     int(0.92 * capacity))

    weight_stream = (2 * C * H + H + C) * wsize
    cost = pl.CostEstimate(
        flops=4 * M * C * H,                # two matmuls, 2*M*C*H each
        transcendentals=M * H,              # one tanh per hidden activation
        bytes_accessed=int(2 * M * C * dsize
                           + (1 if resident else num_m_tiles) * weight_stream),
    )

    if resident:
        kernel = _make_resident_kernel(n_chunks, chunk_h)
        grid_spec = pltpu.PrefetchScalarGridSpec(
            num_scalar_prefetch=0,
            grid=(num_m_tiles,),
            in_specs=[
                pl.BlockSpec((tile_m_eff, C), lambda i: (i, 0)),   # x tokens
                _const_spec((C, H)),                               # W1 resident
                _const_spec((1, H)),                               # b1 resident
                _const_spec((H, C)),                               # W2 resident
                _const_spec((1, C)),                               # b2 resident
            ],
            out_specs=pl.BlockSpec((tile_m_eff, C), lambda i: (i, 0)),
        )
        semantics = ("parallel",)
    else:
        kernel = _make_tiled_kernel(n_chunks, chunk_h)
        grid_spec = pltpu.PrefetchScalarGridSpec(
            num_scalar_prefetch=0,
            grid=(num_m_tiles, H // tile_h_eff),
            in_specs=[
                pl.BlockSpec((tile_m_eff, C), lambda i, j: (i, 0)),    # x
                pl.BlockSpec((C, tile_h_eff), lambda i, j: (0, j)),    # W1 slice
                pl.BlockSpec((1, tile_h_eff), lambda i, j: (0, j)),    # b1 slice
                pl.BlockSpec((tile_h_eff, C), lambda i, j: (j, 0)),    # W2 slice
                pl.BlockSpec((1, C), lambda i, j: (0, 0)),             # b2
            ],
            out_specs=pl.BlockSpec((tile_m_eff, C), lambda i, j: (i, 0)),
            scratch_shapes=[pltpu.VMEM((tile_m_eff, C), jnp.float32)],
        )
        semantics = ("parallel", "arbitrary")

    out = pl.pallas_call(
        kernel,
        out_shape=jax.ShapeDtypeStruct((Mp, C), x.dtype),
        grid_spec=grid_spec,
        compiler_params=pltpu.CompilerParams(
            dimension_semantics=semantics,
            vmem_limit_bytes=int(vmem_limit),
        ),
        cost_estimate=cost,
    )(x2, w1, b1_2, w2, b2_2)

    return out[:M].reshape(B, T, C)


# ---------------------------------------------------------------------------
# params / reference / tests
# ---------------------------------------------------------------------------

def init_mlp_params(key, n_embd, dtype=jnp.float32):
    """Deterministic init matching nn.Linear shapes (stored as [in, out])."""
    h = 4 * n_embd
    k1, k2, k3, k4 = jax.random.split(key, 4)
    lim1 = 1.0 / math.sqrt(n_embd)
    lim2 = 1.0 / math.sqrt(h)
    w1 = jax.random.uniform(k1, (n_embd, h), dtype, minval=-lim1, maxval=lim1)
    b1 = jax.random.uniform(k2, (h,), dtype, minval=-lim1, maxval=lim1)
    w2 = jax.random.uniform(k3, (h, n_embd), dtype, minval=-lim2, maxval=lim2)
    b2 = jax.random.uniform(k4, (n_embd,), dtype, minval=-lim2, maxval=lim2)
    return w1, b1, w2, b2


def _reference(x, w1, b1, w2, b2):
    B, T, C = x.shape
    y = _gelu_tanh(x.reshape(-1, C).astype(jnp.float32) @ w1.astype(jnp.float32)
                   + b1.astype(jnp.float32))
    y = y @ w2.astype(jnp.float32) + b2.astype(jnp.float32)
    return y.reshape(B, T, C)


if __name__ == "__main__":
    key = jax.random.PRNGKey(0)

    # --- test 1: module-sized shapes (n_embd=32 -> hidden=128); resident path
    B, T, C = 2, 8, 32
    kx, kp, krest = jax.random.split(key, 3)
    xa = jax.random.normal(kx, (B, T, C), jnp.float32)
    pa = init_mlp_params(kp, C)
    ya = jax.block_until_ready(mlp_forward(xa, *pa))
    assert ya.shape == (B, T, C)
    assert jnp.allclose(ya, _reference(xa, *pa), atol=2e-2, rtol=2e-2), \
        "mismatch vs reference (resident path)"

    # --- test 2: auto tiling with enough tokens for >=2 parallel blocks -----
    B1, T1, C1 = 4, 128, 128          # M=512, H=512
    kx1, kp1, krest = jax.random.split(krest, 3)
    xb = jax.random.normal(kx1, (B1, T1, C1), jnp.float32)
    pb = init_mlp_params(kp1, C1)
    yb = jax.block_until_ready(mlp_forward(xb, *pb))
    assert yb.shape == (B1, T1, C1)
    assert jnp.allclose(yb, _reference(xb, *pb), atol=2e-2, rtol=2e-2), \
        "mismatch vs reference (auto path)"

    # --- test 3: explicit token/hidden tiling, ragged M, 2-D accumulation ---
    B2, T2, C2 = 2, 21, 128           # M=42 (ragged vs tile_m=16), H=512
    kx2, kp2, krest = jax.random.split(krest, 3)
    xc = jax.random.normal(kx2, (B2, T2, C2), jnp.float32)
    pc = init_mlp_params(kp2, C2)
    yc = jax.block_until_ready(mlp_forward(xc, *pc, tile_m=16, tile_h=128))
    assert yc.shape == (B2, T2, C2)
    assert jnp.allclose(yc, _reference(xc, *pc), atol=2e-2, rtol=2e-2), \
        "mismatch vs reference (tiled path)"

    # --- test 4: bf16 fast path (bf16 MXU feeds, f32 accumulate + f32 GELU) -
    x_bf = xc.astype(jnp.bfloat16)
    p_bf = tuple(p.astype(jnp.bfloat16) for p in pc)
    y_bf = jax.block_until_ready(mlp_forward(x_bf, *p_bf, tile_m=32, tile_h=256))
    assert y_bf.shape == (B2, T2, C2) and y_bf.dtype == jnp.bfloat16
    ref_bf = _reference(x_bf.astype(jnp.float32),
                        *[p.astype(jnp.float32) for p in p_bf])
    assert bool(jnp.all(jnp.isfinite(y_bf.astype(jnp.float32))))
    assert jnp.allclose(y_bf.astype(jnp.float32), ref_bf, atol=1e-1, rtol=1e-1), \
        "mismatch vs reference (bf16 path)"

    print("KERNEL_OK")
</pallas_src>

<mosaic_0001>
module attributes {stable_mosaic.version = 11 : i64} {
  func.func @kernel(%arg0: i32, %arg1: memref<16x32xf32, #tpu.memory_space<vmem>>, %arg2: memref<32x128xf32, #tpu.memory_space<vmem>>, %arg3: memref<1x128xf32, #tpu.memory_space<vmem>>, %arg4: memref<128x32xf32, #tpu.memory_space<vmem>>, %arg5: memref<1x32xf32, #tpu.memory_space<vmem>>, %arg6: memref<16x32xf32, #tpu.memory_space<vmem>>) attributes {dimension_semantics = [#tpu.dimension_semantics<parallel>], iteration_bounds = array<i64: 1>, scalar_prefetch = 0 : i64, scratch_operands = 0 : i64, tpu.core_type = #tpu.core_type<tc>, window_params = [{transform_indices = @transform_0, window_bounds = array<i64: 16, 32>}, {pipeline_mode = #tpu.pipeline_mode<synchronous>, transform_indices = @transform_1, window_bounds = array<i64: 32, 128>}, {pipeline_mode = #tpu.pipeline_mode<synchronous>, transform_indices = @transform_2, window_bounds = array<i64: 1, 128>}, {pipeline_mode = #tpu.pipeline_mode<synchronous>, transform_indices = @transform_3, window_bounds = array<i64: 128, 32>}, {pipeline_mode = #tpu.pipeline_mode<synchronous>, transform_indices = @transform_4, window_bounds = array<i64: 1, 32>}, {transform_indices = @transform_5, window_bounds = array<i64: 16, 32>}]} {
    %c0 = arith.constant 0 : index
    %c0_0 = arith.constant 0 : index
    %0 = vector.load %arg1[%c0, %c0_0] : memref<16x32xf32, #tpu.memory_space<vmem>>, vector<16x32xf32>
    %cst = arith.constant 0.000000e+00 : f32
    %1 = vector.broadcast %cst : f32 to vector<16x32xf32>
    %c0_1 = arith.constant 0 : index
    %c0_2 = arith.constant 0 : index
    %2 = vector.load %arg2[%c0_1, %c0_2] : memref<32x128xf32, #tpu.memory_space<vmem>>, vector<32x128xf32>
    %cst_3 = arith.constant dense<0.000000e+00> : vector<16x128xf32>
    %3 = tpu.matmul %0, %2, %cst_3 {dimension_numbers = #tpu.dot_dimension_numbers<[1], [0], [0], [1], [0, 0, 1, 1], [], []>} : vector<16x32xf32>, vector<32x128xf32>, vector<16x128xf32> -> vector<16x128xf32>
    %c0_4 = arith.constant 0 : index
    %c0_5 = arith.constant 0 : index
    %4 = vector.load %arg3[%c0_4, %c0_5] : memref<1x128xf32, #tpu.memory_space<vmem>>, vector<1x128xf32>
    %5 = vector.broadcast %4 : vector<1x128xf32> to vector<16x128xf32>
    %6 = arith.addf %3, %5 : vector<16x128xf32>
    %cst_6 = arith.constant 5.000000e-01 : f32
    %7 = vector.broadcast %cst_6 : f32 to vector<16x128xf32>
    %8 = arith.mulf %7, %6 : vector<16x128xf32>
    %cst_7 = arith.constant 4.471500e-02 : f32
    %9 = vector.broadcast %cst_7 : f32 to vector<16x128xf32>
    %10 = arith.mulf %9, %6 : vector<16x128xf32>
    %11 = arith.mulf %10, %6 : vector<16x128xf32>
    %12 = arith.mulf %11, %6 : vector<16x128xf32>
    %13 = arith.addf %6, %12 : vector<16x128xf32>
    %cst_8 = arith.constant 0.797884583 : f32
    %14 = vector.broadcast %cst_8 : f32 to vector<16x128xf32>
    %15 = arith.mulf %14, %13 : vector<16x128xf32>
    %16 = math.tanh %15 : vector<16x128xf32>
    %cst_9 = arith.constant 1.000000e+00 : f32
    %17 = vector.broadcast %cst_9 : f32 to vector<16x128xf32>
    %18 = arith.addf %17, %16 : vector<16x128xf32>
    %19 = arith.mulf %8, %18 : vector<16x128xf32>
    %c0_10 = arith.constant 0 : index
    %c0_11 = arith.constant 0 : index
    %20 = vector.load %arg4[%c0_10, %c0_11] : memref<128x32xf32, #tpu.memory_space<vmem>>, vector<128x32xf32>
    %cst_12 = arith.constant dense<0.000000e+00> : vector<16x32xf32>
    %21 = tpu.matmul %19, %20, %cst_12 {dimension_numbers = #tpu.dot_dimension_numbers<[1], [0], [0], [1], [0, 0, 1, 1], [], []>} : vector<16x128xf32>, vector<128x32xf32>, vector<16x32xf32> -> vector<16x32xf32>
    %22 = arith.addf %1, %21 : vector<16x32xf32>
    %c0_13 = arith.constant 0 : index
    %c0_14 = arith.constant 0 : index
    %23 = vector.load %arg5[%c0_13, %c0_14] : memref<1x32xf32, #tpu.memory_space<vmem>>, vector<1x32xf32>
    %24 = vector.broadcast %23 : vector<1x32xf32> to vector<16x32xf32>
    %25 = arith.addf %22, %24 : vector<16x32xf32>
    %c0_15 = arith.constant 0 : index
    %c0_16 = arith.constant 0 : index
    %26 = vector.load %arg6[%c0_15, %c0_16] : memref<16x32xf32, #tpu.memory_space<vmem>>, vector<16x32xf32>
    tpu.vector_store %arg6[%c0_15, %c0_16], %25 {strides = array<i32>} : memref<16x32xf32, #tpu.memory_space<vmem>>, vector<16x32xf32>,
    return
  }
  func.func @transform_0(%arg0: i32) -> (i32, i32) {
    %c0_i32 = arith.constant 0 : i32
    %c0_i32_0 = arith.constant 0 : i32
    return %arg0, %c0_i32 : i32, i32
  }
  func.func @transform_1(%arg0: i32) -> (i32, i32) {
    %c0_i32 = arith.constant 0 : i32
    %c0_i32_0 = arith.constant 0 : i32
    %c0_i32_1 = arith.constant 0 : i32
    return %c0_i32, %c0_i32_0 : i32, i32
  }
  func.func @transform_2(%arg0: i32) -> (i32, i32) {
    %c0_i32 = arith.constant 0 : i32
    %c0_i32_0 = arith.constant 0 : i32
    %c0_i32_1 = arith.constant 0 : i32
    return %c0_i32, %c0_i32_0 : i32, i32
  }
  func.func @transform_3(%arg0: i32) -> (i32, i32) {
    %c0_i32 = arith.constant 0 : i32
    %c0_i32_0 = arith.constant 0 : i32
    %c0_i32_1 = arith.constant 0 : i32
    return %c0_i32, %c0_i32_0 : i32, i32
  }
  func.func @transform_4(%arg0: i32) -> (i32, i32) {
    %c0_i32 = arith.constant 0 : i32
    %c0_i32_0 = arith.constant 0 : i32
    %c0_i32_1 = arith.constant 0 : i32
    return %c0_i32, %c0_i32_0 : i32, i32
  }
  func.func @transform_5(%arg0: i32) -> (i32, i32) {
    %c0_i32 = arith.constant 0 : i32
    %c0_i32_0 = arith.constant 0 : i32
    return %arg0, %c0_i32 : i32, i32
  }
}

</mosaic_0001>

<bundles_post_ra>
// kernel: mlp_forward.1
= control target key start
LH: loop header
LB: loop body
LE: loop exit
PB: predicated region body
PF: predicated region fallthrough
CT: control target
= control target key end

     0   :  { %s307_s0 = inlined_call_operand.vmem [shape: f32[16,32], index: 0, kind: input, shape index: {}]   ;;  %s308_s1 = inlined_call_operand.vmem [shape: f32[32,128], index: 1, kind: input, shape index: {}]   ;;  %s309_s2 = inlined_call_operand.vmem [shape: f32[1,128], index: 2, kind: input, shape index: {}]   ;;  %s310_s3 = inlined_call_operand.vmem [shape: f32[128,32], index: 3, kind: input, shape index: {}]   ;;  %s311_s4 = inlined_call_operand.vmem [shape: f32[1,32], index: 4, kind: input, shape index: {}]   ;;  %s312_s5 = inlined_call_operand.hbm [shape: f32[16,32], index: 5, kind: output, shape index: {}]  }
   0x1   :  { %v26_v0 = vld [vmem:[%s308_s1 + $0x18] sm:$0xff]  ;;  %v25_v1 = vld [vmem:[%s308_s1 + $0x10] sm:$0xff]  ;;  %v24_v2 = vld [vmem:[%s308_s1 + $0x8] sm:$0xff] }
   0x2   :  { %50 = vmatpush.msra.mxu0 %v26_v0  ;;  %v94_v3 = vld [vmem:[%s310_s3 + $0x78] sm:$0xff]  ;;  %v93_v4 = vld [vmem:[%s310_s3 + $0x70] sm:$0xff]  ;;  %v23_v5 = vld [vmem:[%s308_s1] sm:$0xff] }
   0x3   :  { %99 = vmatpush.msra.mxu1 %v94_v3  ;;  %v92_v6 = vld [vmem:[%s310_s3 + $0x68] sm:$0xff]  ;;  %144 = vmatpush.msra.mxu2 %v94_v3 }
   0x4   :  { %51 = vmatpush.msra.mxu0 %v25_v1 }
   0x5   :  { %10 = vsyncpa [#allocation3], 0  ;;  %v21_v7 = vld [vmem:[%s307_s0] sm:$0xff]  ;;  %vm31_vm0 = vcmask 261120   ;;  %100 = vmatpush.msra.mxu1 %v93_v4  ;;  %145 = vmatpush.msra.mxu2 %v93_v4  ;;  %v22_v9 = vld [vmem:[%s307_s0 + $0x8] sm:$0xff]  ;;  %s195_s11 = smov [#allocation2]  }
   0x6   :  { %52 = vmatpush.msra.mxu0 %v24_v2  ;;  %v91_v8 = vld [vmem:[%s310_s3 + $0x60] sm:$0xff]  ;;  %v90_v10 = vld [vmem:[%s310_s3 + $0x58] sm:$0xff]  ;;  %v89_v11 = vld [vmem:[%s310_s3 + $0x50] sm:$0xff]  ;;  %s128_s12 = sshll.u32 %s195_s11, 4  ;;  %s130_s15 = sshll.u32 %s312_s5, 4  ;;  %s129_s12 = int_to_ptr.vmem [resolvable:$true] %s128_s12  ;;  %s131_s15 = int_to_ptr.hbm [resolvable:$true] %s130_s15 }
   0x7   :  { %101 = vmatpush.msra.mxu1 %v92_v6  ;;  %146 = vmatpush.msra.mxu2 %v92_v6  ;;  %v88_v12 = vld [vmem:[%s310_s3 + $0x48] sm:$0xff]  ;;  %v87_v13 = vld [vmem:[%s310_s3 + $0x40] sm:$0xff]  ;;  %v86_v14 = vld [vmem:[%s310_s3 + $0x38] sm:$0xff]  ;;  %s196_s16 = smov 128   ;;  %s197_s17 = smov 8  }
   0x8   :  { %53 = vmatpush.msra.mxu0 %v23_v5  ;;  %v85_v15 = vld [vmem:[%s310_s3 + $0x30] sm:$0xff]  ;;  %v84_v16 = vld [vmem:[%s310_s3 + $0x28] sm:$0xff]  ;;  %v83_v17 = vld [vmem:[%s310_s3 + $0x20] sm:$0xff] }
   0x9   :  { %142 = vmatmul.msk.f32.vlgmr.msra.gmra.mxu0 %vm31_vm0, %v21_v7  ;;  %102 = vmatpush.msra.mxu1 %v91_v8  ;;  %v82_v18 = vld [vmem:[%s310_s3 + $0x18] sm:$0xff]  ;;  %v81_v19 = vld [vmem:[%s310_s3 + $0x10] sm:$0xff]  ;;  %v80_v20 = vld [vmem:[%s310_s3 + $0x8] sm:$0xff] }
   0xa   :  { %147 = vmatpush.msra.mxu2 %v91_v8  ;;  %v79_v21 = vld [vmem:[%s310_s3] sm:$0xff] }
   0xb   :  { %103 = vmatpush.msra.mxu1 %v90_v10  ;;  %v163_v22 = vld [vmem:[%s309_s2] ss:$0 sm:$0xff] }
   0xc   :  { %148 = vmatpush.msra.mxu2 %v90_v10  ;;  %v164_v45 = vld [vmem:[%s311_s4] ss:$0 sm:$0xff] }
   0xd   :  { %104 = vmatpush.msra.mxu1 %v89_v11 }
   0xe   :  { %149 = vmatpush.msra.mxu2 %v89_v11 }
   0xf   :  { %105 = vmatpush.msra.mxu1 %v88_v12 }
  0x10   :  { %150 = vmatpush.msra.mxu2 %v88_v12 }
  0x11   :  { %143 = vmatmul.msk.f32.gmra.mxu0 %vm31_vm0, %v22_v9  ;;  %106 = vmatpush.msra.mxu1 %v87_v13 }
  0x12   :  { %151 = vmatpush.msra.mxu2 %v87_v13 }
  0x13   :  { %107 = vmatpush.msra.mxu1 %v86_v14 }
  0x14   :  { %152 = vmatpush.msra.mxu2 %v86_v14 }
  0x15   :  { %108 = vmatpush.msra.mxu1 %v85_v15 }
  0x16   :  { %153 = vmatpush.msra.mxu2 %v85_v15 }
  0x17   :  { %109 = vmatpush.msra.mxu1 %v84_v16 }
  0x18   :  { %154 = vmatpush.msra.mxu2 %v84_v16 }
  0x19   :  { %110 = vmatpush.msra.mxu1 %v83_v17 }
  0x1a   :  { %155 = vmatpush.msra.mxu2 %v83_v17 }
  0x1b   :  { %111 = vmatpush.msra.mxu1 %v82_v18 }
  0x1c   :  { %156 = vmatpush.msra.mxu2 %v82_v18 }
  0x1d   :  { %112 = vmatpush.msra.mxu1 %v81_v19 }
  0x1e   :  { %157 = vmatpush.msra.mxu2 %v81_v19 }
  0x1f   :  { %113 = vmatpush.msra.mxu1 %v80_v20 }
  0x20   :  { %158 = vmatpush.msra.mxu2 %v80_v20 }
  0x21   :  { %114 = vmatpush.msra.mxu1 %v79_v21 }
  0x22   :  { %159 = vmatpush.msra.mxu2 %v79_v21 }
  0x86   :  { %v55_v23 = vpop.f32.mrf.mxu0 }
  0x87   :  { %v56_v24 = vadd.f32 %v163_v22, %v55_v23 }
  0x89   :  { %v63_v25 = vmul.f32 0.044715, %v56_v24  ;;  %v61_v38 = vmul.f32 0.5, %v56_v24 }
  0x8b   :  { %v65_v26 = vmul.f32 %v63_v25, %v56_v24 }
  0x8d   :  { %v67_v27 = vmul.f32 %v65_v26, %v56_v24 }
  0x8e   :  { %v58_v28 = vpop.f32.mrf.mxu0 }
  0x8f   :  { %v59_v29 = vadd.f32 %v163_v22, %v58_v28  ;;  %v69_v30 = vadd.f32 %v67_v27, %v56_v24 }
  0x91   :  { %v71_v31 = vmul.f32 0.7978846, %v69_v30  ;;  %v64_v32 = vmul.f32 0.044715, %v59_v29  ;;  %v62_v42 = vmul.f32 0.5, %v59_v29 }
  0x93   :  { %165 = vtanh.f32 %v71_v31  ;;  %v66_v33 = vmul.f32 %v64_v32, %v59_v29 }
  0x95   :  { %v68_v34 = vmul.f32 %v66_v33, %v59_v29 }
  0x97   :  { %v70_v35 = vadd.f32 %v68_v34, %v59_v29 }
  0x99   :  { %v166_v36 = vpop.eup %165  ;;  %v72_v37 = vmul.f32 0.7978846, %v70_v35 }
  0x9a   :  { %v75_v39 = vadd.f32 1.0, %v166_v36 }
  0x9b   :  { %167 = vtanh.f32 %v72_v37 }
  0x9c   :  { %v77_v40 = vmul.f32 %v75_v39, %v61_v38 }
  0x9e   :  { %115 = vmatmul.f32.vlgmr.msra.gmra.mxu1 %v77_v40 }
  0xa1   :  { %v168_v41 = vpop.eup %167 }
  0xa2   :  { %v76_v43 = vadd.f32 1.0, %v168_v41 }
  0xa4   :  { %v78_v44 = vmul.f32 %v76_v43, %v62_v42 }
  0xa6   :  { %118 = vmatmul.f32.vlgmr.msra.gmra.mxu2 %v78_v44 }
 0x11b   :  { %v116_v46 = vpop.f32.mrf.mxu1 }
 0x11c   :  { %v117_v47 = vadd.f32 %v164_v45, %v116_v46 }
 0x11e   :  { %122 = vst.msk [vmem:[#allocation2] sm:$0xff] %vm31_vm0, %v117_v47 }
 0x129   :  { %v119_v48 = vpop.f32.mrf.mxu2 }
 0x12a   :  { %v120_v49 = vadd.f32 %v164_v45, %v119_v48 }
 0x12c   :  { %123 = vst.msk [vmem:[#allocation2 + $0x8] sm:$0xff] %vm31_vm0, %v120_v49 }
 0x12d   :  { %136 = dma.vmem_to_hbm [thread:$0]  %s129_s12, 256, %s131_s15, [#allocation3], %s196_s16, %s196_s16, %s197_s17  }
 0x12e   :  { %193 = dma.done.wait [#allocation3], 256  }
 0x12f   :  { %194 = vsyncadd [#allocation3], 4294967040 }
 0x130   :  { %141 = vsyncpa [#allocation3], 1 }

</bundles_post_ra>
